<compile_context>
chip_gen: v7x
topology: tpu7x:2x2x1
jax: 0.10.0
libtpu: 0.0.40
codegen_flags: <defaults>
</compile_context>

<pallas_src>
import functools

import jax
import jax.numpy as jnp
from jax.experimental import pallas as pl
from jax.experimental.pallas import tpu as pltpu


def _round_up(n, m):
    return ((n + m - 1) // m) * m


def club_sample_kernel(x_ref, y_ref, yp_ref,
                       w1_ref, b1_ref, w2_ref, b2_ref,
                       o_ref):
    i = pl.program_id(0)

    @pl.when(i == 0)
    def _init():
        o_ref[...] = jnp.zeros_like(o_ref)

    y_dim = w2_ref.shape[-1] // 2           # static (trace-time) int

    x = x_ref[...]                          # (TM, Dx), possibly bf16

    # Fused layer 1 (mu-head | logvar-head share one matmul), f32 accumulate.
    h = jnp.maximum(
        jnp.dot(x, w1_ref[...], preferred_element_type=jnp.float32)
        + b1_ref[...], 0.0)                 # (TM, 2*h2) f32

    # Fused layer 2 via block-diagonal weight -> [mu | logvar_pre].
    z = jnp.dot(h.astype(w2_ref.dtype), w2_ref[...],
                preferred_element_type=jnp.float32) + b2_ref[...]  # (TM, 2*Dy)

    mu = z[:, :y_dim]                                   # (TM, Dy) f32
    inv_var = jnp.exp(-jnp.tanh(z[:, y_dim:]))          # 1 / exp(logvar), EUP

    y = y_ref[...].astype(jnp.float32)
    yp = yp_ref[...].astype(jnp.float32)

    # positive - negative = ((mu - y_perm)^2 - (mu - y)^2) / exp(logvar)
    diff = ((mu - yp) ** 2 - (mu - y) ** 2) * inv_var   # (TM, Dy) f32

    partial = jnp.sum(jnp.sum(diff, axis=-1, keepdims=True),
                      axis=0, keepdims=True)            # (1, 1)
    o_ref[...] += partial


@functools.partial(jax.jit, static_argnames=("block_rows", "stream_dtype"))
def _club_sample_call(x, y, y_perm, w1, b1, w2, b2, *,
                      block_rows, stream_dtype):
    n, _ = x.shape

    # Block rows: multiple of 8 (sublane), capped by the (8-padded) batch.
    tm = min(_round_up(block_rows, 8), _round_up(n, 8))
    n_pad = _round_up(n, tm)
    grid = n_pad // tm

    def pad(a):
        return jnp.pad(a, ((0, n_pad - n), (0, 0)))

    xs = pad(x).astype(stream_dtype)
    ys = pad(y).astype(stream_dtype)       # zero-padded rows contribute 0
    yps = pad(y_perm).astype(stream_dtype)
    w1s = w1.astype(stream_dtype)
    w2s = w2.astype(stream_dtype)

    def row_spec(a):
        return pl.BlockSpec((tm, a.shape[1]), lambda i: (i, 0))

    def const_spec(a):
        # Constant block index -> weights/biases stay VMEM-resident.
        return pl.BlockSpec(a.shape, lambda i: (0, 0))

    out = pl.pallas_call(
        club_sample_kernel,
        out_shape=jax.ShapeDtypeStruct((1, 1), jnp.float32),
        grid=(grid,),
        in_specs=[row_spec(xs), row_spec(ys), row_spec(yps),
                  const_spec(w1s), const_spec(b1),
                  const_spec(w2s), const_spec(b2)],
        out_specs=pl.BlockSpec((1, 1), lambda i: (0, 0)),
        compiler_params=pltpu.CompilerParams(
            # Output accumulates across the batch grid axis -> "arbitrary".
            dimension_semantics=("arbitrary",)),
    )(xs, ys, yps, w1s, b1, w2s, b2)

    return out[0, 0] / (2.0 * n)


def club_sample_forward(x, y, y_perm, packed_params, *,
                        block_rows=2048, stream_dtype=jnp.float32):
    """packed_params = (w1, b1, w2, b2) from pack_params()."""
    w1, b1, w2, b2 = packed_params
    return _club_sample_call(x, y, y_perm, w1, b1, w2, b2,
                             block_rows=block_rows, stream_dtype=stream_dtype)


def init_params(key, x_dim, y_dim, hidden_size):
    """Deterministic xavier-normal-style init; weights stored as [in, out]."""
    h2 = hidden_size // 2
    ks = jax.random.split(key, 4)

    def xavier(k, fan_in, fan_out):
        std = (2.0 / (fan_in + fan_out)) ** 0.5
        return jax.random.normal(k, (fan_in, fan_out), jnp.float32) * std

    w1m = xavier(ks[0], x_dim, h2)
    b1m = jnp.zeros((1, h2), jnp.float32)
    w2m = xavier(ks[1], h2, y_dim)
    b2m = jnp.zeros((1, y_dim), jnp.float32)
    w1v = xavier(ks[2], x_dim, h2)
    b1v = jnp.zeros((1, h2), jnp.float32)
    w2v = xavier(ks[3], h2, y_dim)
    b2v = jnp.zeros((1, y_dim), jnp.float32)
    return (w1m, b1m, w2m, b2m, w1v, b1v, w2v, b2v)


def pack_params(raw_params):
    """Fuse the two heads: concat layer-1, block-diagonal layer-2."""
    (w1m, b1m, w2m, b2m, w1v, b1v, w2v, b2v) = raw_params
    h2 = w1m.shape[1]
    y_dim = w2m.shape[1]
    w1 = jnp.concatenate([w1m, w1v], axis=1)            # (Dx, 2*h2)
    b1 = jnp.concatenate([b1m, b1v], axis=1)            # (1, 2*h2)
    w2 = jnp.zeros((2 * h2, 2 * y_dim), jnp.float32)
    w2 = w2.at[:h2, :y_dim].set(w2m).at[h2:, y_dim:].set(w2v)  # block-diag
    b2 = jnp.concatenate([b2m, b2v], axis=1)            # (1, 2*Dy)
    return (w1, b1, w2, b2)


def reference_forward(x, y, y_perm, raw_params, cast_dtype=None):
    """Pure-JAX reference matching the PyTorch module. If cast_dtype is set,
    mirrors the kernel's low-precision streaming (f32 accumulate/epilogue)."""
    (w1m, b1m, w2m, b2m, w1v, b1v, w2v, b2v) = raw_params
    if cast_dtype is not None:
        cast = lambda a: a.astype(cast_dtype)
        x, y, y_perm = cast(x), cast(y), cast(y_perm)
        w1m, w2m, w1v, w2v = cast(w1m), cast(w2m), cast(w1v), cast(w2v)
    f32 = jnp.float32
    h_mu = jnp.maximum(jnp.dot(x, w1m, preferred_element_type=f32) + b1m, 0.0)
    h_lv = jnp.maximum(jnp.dot(x, w1v, preferred_element_type=f32) + b1v, 0.0)
    if cast_dtype is not None:
        h_mu = h_mu.astype(cast_dtype)
        h_lv = h_lv.astype(cast_dtype)
    mu = jnp.dot(h_mu, w2m, preferred_element_type=f32) + b2m
    logvar = jnp.tanh(jnp.dot(h_lv, w2v, preferred_element_type=f32) + b2v)
    yf = y.astype(f32)
    ypf = y_perm.astype(f32)
    pos = -(mu - yf) ** 2 / jnp.exp(logvar)
    neg = -(mu - ypf) ** 2 / jnp.exp(logvar)
    return (pos.sum(-1) - neg.sum(-1)).mean() / 2.0


if __name__ == "__main__":
    x_dim, y_dim, hidden_size = 32, 32, 32

    key = jax.random.PRNGKey(0)
    k_param, k_x, k_y, k_perm, k_x2, k_y2, k_perm2 = jax.random.split(key, 7)

    raw = init_params(k_param, x_dim, y_dim, hidden_size)
    packed = pack_params(raw)

    # --- Test 1: small batch, single grid step, f32 streaming -------------
    batch = 8
    x = jax.random.normal(k_x, (batch, x_dim), jnp.float32)
    y = jax.random.normal(k_y, (batch, y_dim), jnp.float32)
    # torch.randperm equivalent done in glue JAX (deterministic via PRNGKey).
    y_perm = y[jax.random.permutation(k_perm, batch)]

    out = jax.block_until_ready(club_sample_forward(x, y, y_perm, packed))
    ref = reference_forward(x, y, y_perm, raw)
    assert jnp.allclose(out, ref, atol=1e-4, rtol=1e-4), (out, ref)

    # --- Test 2: ragged batch, multi-step grid accumulation, f32 ----------
    batch2 = 300                          # not a multiple of the block size
    x2 = jax.random.normal(k_x2, (batch2, x_dim), jnp.float32)
    y2 = jax.random.normal(k_y2, (batch2, y_dim), jnp.float32)
    y2_perm = y2[jax.random.permutation(k_perm2, batch2)]

    out2 = jax.block_until_ready(
        club_sample_forward(x2, y2, y2_perm, packed, block_rows=128))
    ref2 = reference_forward(x2, y2, y2_perm, raw)
    assert jnp.allclose(out2, ref2, atol=1e-4, rtol=1e-4), (out2, ref2)

    # --- Test 3: bf16 streaming path (halves HBM traffic, f32 epilogue) ---
    out_bf16 = jax.block_until_ready(
        club_sample_forward(x2, y2, y2_perm, packed, block_rows=128,
                            stream_dtype=jnp.bfloat16))
    ref_bf16 = reference_forward(x2, y2, y2_perm, raw, cast_dtype=jnp.bfloat16)
    assert jnp.allclose(out_bf16, ref_bf16, atol=1e-2, rtol=1e-2), (
        out_bf16, ref_bf16)

    print("KERNEL_OK")
</pallas_src>

<mosaic_0001>
module attributes {stable_mosaic.version = 11 : i64} {
  func.func @club_sample_kernel(%arg0: i32, %arg1: memref<8x32xf32, #tpu.memory_space<vmem>>, %arg2: memref<8x32xf32, #tpu.memory_space<vmem>>, %arg3: memref<8x32xf32, #tpu.memory_space<vmem>>, %arg4: memref<32x32xf32, #tpu.memory_space<vmem>>, %arg5: memref<1x32xf32, #tpu.memory_space<vmem>>, %arg6: memref<32x64xf32, #tpu.memory_space<vmem>>, %arg7: memref<1x64xf32, #tpu.memory_space<vmem>>, %arg8: memref<1x1xf32, #tpu.memory_space<vmem>>) attributes {dimension_semantics = [#tpu.dimension_semantics<arbitrary>], iteration_bounds = array<i64: 1>, scalar_prefetch = 0 : i64, scratch_operands = 0 : i64, tpu.core_type = #tpu.core_type<tc>, window_params = [{transform_indices = @transform_0, window_bounds = array<i64: 8, 32>}, {transform_indices = @transform_1, window_bounds = array<i64: 8, 32>}, {transform_indices = @transform_2, window_bounds = array<i64: 8, 32>}, {pipeline_mode = #tpu.pipeline_mode<synchronous>, transform_indices = @transform_3, window_bounds = array<i64: 32, 32>}, {pipeline_mode = #tpu.pipeline_mode<synchronous>, transform_indices = @transform_4, window_bounds = array<i64: 1, 32>}, {pipeline_mode = #tpu.pipeline_mode<synchronous>, transform_indices = @transform_5, window_bounds = array<i64: 32, 64>}, {pipeline_mode = #tpu.pipeline_mode<synchronous>, transform_indices = @transform_6, window_bounds = array<i64: 1, 64>}, {pipeline_mode = #tpu.pipeline_mode<synchronous>, transform_indices = @transform_7, window_bounds = array<i64: 1, 1>}]} {
    %c0_i32 = arith.constant 0 : i32
    %0 = arith.cmpi eq, %arg0, %c0_i32 : i32
    %1 = arith.extui %0 : i1 to i32
    %c0_i32_0 = arith.constant 0 : i32
    %2 = arith.cmpi ne, %1, %c0_i32_0 : i32
    scf.if %2 {
      %cst_23 = arith.constant 0.000000e+00 : f32
      %37 = vector.broadcast %cst_23 : f32 to vector<1x1xf32>
      %c0_24 = arith.constant 0 : index
      %c0_25 = arith.constant 0 : index
      %38 = vector.load %arg8[%c0_24, %c0_25] : memref<1x1xf32, #tpu.memory_space<vmem>>, vector<1x1xf32>
      tpu.vector_store %arg8[%c0_24, %c0_25], %37 {strides = array<i32>} : memref<1x1xf32, #tpu.memory_space<vmem>>, vector<1x1xf32>,
    } else {
    }
    %c0 = arith.constant 0 : index
    %c0_1 = arith.constant 0 : index
    %3 = vector.load %arg1[%c0, %c0_1] : memref<8x32xf32, #tpu.memory_space<vmem>>, vector<8x32xf32>
    %c0_2 = arith.constant 0 : index
    %c0_3 = arith.constant 0 : index
    %4 = vector.load %arg4[%c0_2, %c0_3] : memref<32x32xf32, #tpu.memory_space<vmem>>, vector<32x32xf32>
    %cst = arith.constant dense<0.000000e+00> : vector<8x32xf32>
    %5 = tpu.matmul %3, %4, %cst {dimension_numbers = #tpu.dot_dimension_numbers<[1], [0], [0], [1], [0, 0, 1, 1], [], []>} : vector<8x32xf32>, vector<32x32xf32>, vector<8x32xf32> -> vector<8x32xf32>
    %c0_4 = arith.constant 0 : index
    %c0_5 = arith.constant 0 : index
    %6 = vector.load %arg5[%c0_4, %c0_5] : memref<1x32xf32, #tpu.memory_space<vmem>>, vector<1x32xf32>
    %7 = vector.broadcast %6 : vector<1x32xf32> to vector<8x32xf32>
    %8 = arith.addf %5, %7 : vector<8x32xf32>
    %cst_6 = arith.constant 0.000000e+00 : f32
    %9 = vector.broadcast %cst_6 : f32 to vector<8x32xf32>
    %10 = arith.maximumf %8, %9 : vector<8x32xf32>
    %c0_7 = arith.constant 0 : index
    %c0_8 = arith.constant 0 : index
    %11 = vector.load %arg6[%c0_7, %c0_8] : memref<32x64xf32, #tpu.memory_space<vmem>>, vector<32x64xf32>
    %cst_9 = arith.constant dense<0.000000e+00> : vector<8x64xf32>
    %12 = tpu.matmul %10, %11, %cst_9 {dimension_numbers = #tpu.dot_dimension_numbers<[1], [0], [0], [1], [0, 0, 1, 1], [], []>} : vector<8x32xf32>, vector<32x64xf32>, vector<8x64xf32> -> vector<8x64xf32>
    %c0_10 = arith.constant 0 : index
    %c0_11 = arith.constant 0 : index
    %13 = vector.load %arg7[%c0_10, %c0_11] : memref<1x64xf32, #tpu.memory_space<vmem>>, vector<1x64xf32>
    %14 = vector.broadcast %13 : vector<1x64xf32> to vector<8x64xf32>
    %15 = arith.addf %12, %14 : vector<8x64xf32>
    %16 = vector.extract_strided_slice %15 {offsets = [0, 0], sizes = [8, 32], strides = [1, 1]} : vector<8x64xf32> to vector<8x32xf32>
    %17 = vector.extract_strided_slice %15 {offsets = [0, 32], sizes = [8, 32], strides = [1, 1]} : vector<8x64xf32> to vector<8x32xf32>
    %18 = math.tanh %17 : vector<8x32xf32>
    %cst_12 = arith.constant 0.000000e+00 : f32
    %19 = vector.broadcast %cst_12 : f32 to vector<8x32xf32>
    %20 = arith.subf %19, %18 : vector<8x32xf32>
    %21 = math.exp %20 : vector<8x32xf32>
    %c0_13 = arith.constant 0 : index
    %c0_14 = arith.constant 0 : index
    %22 = vector.load %arg2[%c0_13, %c0_14] : memref<8x32xf32, #tpu.memory_space<vmem>>, vector<8x32xf32>
    %c0_15 = arith.constant 0 : index
    %c0_16 = arith.constant 0 : index
    %23 = vector.load %arg3[%c0_15, %c0_16] : memref<8x32xf32, #tpu.memory_space<vmem>>, vector<8x32xf32>
    %24 = arith.subf %16, %23 : vector<8x32xf32>
    %25 = arith.mulf %24, %24 : vector<8x32xf32>
    %26 = arith.subf %16, %22 : vector<8x32xf32>
    %27 = arith.mulf %26, %26 : vector<8x32xf32>
    %28 = arith.subf %25, %27 : vector<8x32xf32>
    %29 = arith.mulf %28, %21 : vector<8x32xf32>
    %cst_17 = arith.constant dense<0.000000e+00> : vector<8xf32>
    %30 = vector.multi_reduction <add>, %29, %cst_17 [1] : vector<8x32xf32> to vector<8xf32>
    %31 = vector.shape_cast %30 : vector<8xf32> to vector<8x1xf32>
    %cst_18 = arith.constant dense<0.000000e+00> : vector<1xf32>
    %32 = vector.multi_reduction <add>, %31, %cst_18 [0] : vector<8x1xf32> to vector<1xf32>
    %33 = vector.shape_cast %32 : vector<1xf32> to vector<1x1xf32>
    %c0_19 = arith.constant 0 : index
    %c0_20 = arith.constant 0 : index
    %34 = vector.load %arg8[%c0_19, %c0_20] : memref<1x1xf32, #tpu.memory_space<vmem>>, vector<1x1xf32>
    %35 = arith.addf %34, %33 : vector<1x1xf32>
    %c0_21 = arith.constant 0 : index
    %c0_22 = arith.constant 0 : index
    %36 = vector.load %arg8[%c0_21, %c0_22] : memref<1x1xf32, #tpu.memory_space<vmem>>, vector<1x1xf32>
    tpu.vector_store %arg8[%c0_21, %c0_22], %35 {strides = array<i32>} : memref<1x1xf32, #tpu.memory_space<vmem>>, vector<1x1xf32>,
    return
  }
  func.func @transform_0(%arg0: i32) -> (i32, i32) {
    %c0_i32 = arith.constant 0 : i32
    %c0_i32_0 = arith.constant 0 : i32
    return %arg0, %c0_i32 : i32, i32
  }
  func.func @transform_1(%arg0: i32) -> (i32, i32) {
    %c0_i32 = arith.constant 0 : i32
    %c0_i32_0 = arith.constant 0 : i32
    return %arg0, %c0_i32 : i32, i32
  }
  func.func @transform_2(%arg0: i32) -> (i32, i32) {
    %c0_i32 = arith.constant 0 : i32
    %c0_i32_0 = arith.constant 0 : i32
    return %arg0, %c0_i32 : i32, i32
  }
  func.func @transform_3(%arg0: i32) -> (i32, i32) {
    %c0_i32 = arith.constant 0 : i32
    %c0_i32_0 = arith.constant 0 : i32
    %c0_i32_1 = arith.constant 0 : i32
    return %c0_i32, %c0_i32_0 : i32, i32
  }
  func.func @transform_4(%arg0: i32) -> (i32, i32) {
    %c0_i32 = arith.constant 0 : i32
    %c0_i32_0 = arith.constant 0 : i32
    %c0_i32_1 = arith.constant 0 : i32
    return %c0_i32, %c0_i32_0 : i32, i32
  }
  func.func @transform_5(%arg0: i32) -> (i32, i32) {
    %c0_i32 = arith.constant 0 : i32
    %c0_i32_0 = arith.constant 0 : i32
    %c0_i32_1 = arith.constant 0 : i32
    return %c0_i32, %c0_i32_0 : i32, i32
  }
  func.func @transform_6(%arg0: i32) -> (i32, i32) {
    %c0_i32 = arith.constant 0 : i32
    %c0_i32_0 = arith.constant 0 : i32
    %c0_i32_1 = arith.constant 0 : i32
    return %c0_i32, %c0_i32_0 : i32, i32
  }
  func.func @transform_7(%arg0: i32) -> (i32, i32) {
    %c0_i32 = arith.constant 0 : i32
    %c0_i32_0 = arith.constant 0 : i32
    %c0_i32_1 = arith.constant 0 : i32
    return %c0_i32, %c0_i32_0 : i32, i32
  }
}

</mosaic_0001>

<bundles_post_ra>
// kernel: _club_sample_call.1
= control target key start
LH: loop header
LB: loop body
LE: loop exit
PB: predicated region body
PF: predicated region fallthrough
CT: control target
= control target key end

     0   :  { %12 = vsyncpa [#allocation3], 0  ;;  %s664_s0 = inlined_call_operand.hbm [shape: f32[8,32], index: 0, kind: input, shape index: {}]   ;;  %s665_s1 = inlined_call_operand.hbm [shape: f32[8,32], index: 1, kind: input, shape index: {}]   ;;  %s666_s2 = inlined_call_operand.hbm [shape: f32[8,32], index: 2, kind: input, shape index: {}]   ;;  %s667_s3 = inlined_call_operand.hbm [shape: f32[32,32], index: 3, kind: input, shape index: {}]   ;;  %s668_s4 = inlined_call_operand.vmem [shape: f32[1,32], index: 4, kind: input, shape index: {}]   ;;  %s669_s5 = inlined_call_operand.hbm [shape: f32[32,64], index: 5, kind: input, shape index: {}]   ;;  %s670_s6 = inlined_call_operand.vmem [shape: f32[1,64], index: 6, kind: input, shape index: {}]   ;;  %s671_s7 = inlined_call_operand.hbm [shape: f32[1,1], index: 7, kind: output, shape index: {}]  }
   0x1   :  { %13 = vsyncpa [#allocation6], 0 }
   0x2   :  { %14 = vsyncpa [#allocation9], 0 }
   0x3   :  { %15 = vsyncpa [#allocation4], 0  ;;  %s516_s24 = smov [#allocation5]   ;;  %s517_s26 = smov [#allocation8]  }
   0x4   :  { %s32_s25 = sshll.u32 %s516_s24, 4  ;;  %s51_s27 = sshll.u32 %s517_s26, 4  ;;  %s33_s25 = int_to_ptr.vmem [resolvable:$true] %s32_s25  ;;  %s568_s27 = int_to_ptr.vmem [resolvable:$true] %s51_s27 }
   0x5   :  { %s376_s30 = scalar_lea.hbm %s665_s1, 128 }
   0x6   :  { %p377_p0 = scmp.ne.s32.totalorder %s665_s1, %s376_s30  ;;  %p380_p1 = scmp.lt.u32.totalorder %s376_s30, %s665_s1 }
   0x8   :  { %p382_p2 = pnand %p380_p1, %p377_p0 }
   0xa   :  { %385 = shalt.err (!%p382_p2)
}
   0xb   :  { %s386_s12 = scalar_lea.vmem %s33_s25, 128  ;;  %p391_p4 = scmp.lt.s32.totalorder %s33_s25, %s33_s25 }
   0xc   :  { %p387_p3 = scmp.ne.s32.totalorder %s33_s25, %s386_s12  ;;  %p392_p5 = scmp.lt.s32.totalorder %s386_s12, %s386_s12 }
   0xe   :  { %p393_p6 = por %p392_p5, %p391_p4 }
  0x10   :  { %p394_p7 = pnand %p393_p6, %p387_p3 }
  0x12   :  { %397 = shalt.err (!%p394_p7)
}
  0x13   :  { %35 = dma.hbm_to_vmem [thread:$0]  %s665_s1, 128, %s33_s25, [#allocation6]  }
  0x14   :  { %s398_s17 = scalar_lea.hbm %s667_s3, 512 }
  0x15   :  { %p399_p8 = scmp.ne.s32.totalorder %s667_s3, %s398_s17  ;;  %p402_p9 = scmp.lt.u32.totalorder %s398_s17, %s667_s3 }
  0x17   :  { %p404_p10 = pnand %p402_p9, %p399_p8 }
  0x19   :  { %407 = shalt.err (!%p404_p10)
}
  0x1a   :  { %s408_s22 = scalar_lea.vmem %s568_s27, 512  ;;  %p413_p12 = scmp.lt.s32.totalorder %s568_s27, %s568_s27 }
  0x1b   :  { %p409_p11 = scmp.ne.s32.totalorder %s568_s27, %s408_s22  ;;  %p414_p13 = scmp.lt.s32.totalorder %s408_s22, %s408_s22 }
  0x1d   :  { %p415_p0 = por %p414_p13, %p413_p12 }
  0x1f   :  { %p416_p1 = pnand %p415_p0, %p409_p11 }
  0x21   :  { %419 = shalt.err (!%p416_p1)
}
  0x22   :  { %s518_s1 = smov 128   ;;  %s519_s23 = smov 8  }
  0x23   :  { %57 = dma.hbm_to_vmem [thread:$0]  %s667_s3, 512, %s568_s27, [#allocation9], %s518_s1, %s518_s1, %s519_s23  }
  0x24   :  { %s520_s26 = smov [#allocation2]   ;;  %s521_s29 = smov [#allocation7]  }
  0x25   :  { %s22_s28 = sshll.u32 %s520_s26, 4  ;;  %s42_s30 = sshll.u32 %s521_s29, 4  ;;  %s23_s28 = int_to_ptr.vmem [resolvable:$true] %s22_s28  ;;  %s43_s30 = int_to_ptr.vmem [resolvable:$true] %s42_s30 }
  0x26   :  { %s420_s10 = scalar_lea.hbm %s664_s0, 128 }
  0x27   :  { %p421_p2 = scmp.ne.s32.totalorder %s664_s0, %s420_s10  ;;  %p424_p3 = scmp.lt.u32.totalorder %s420_s10, %s664_s0 }
  0x29   :  { %p426_p4 = pnand %p424_p3, %p421_p2 }
  0x2b   :  { %429 = shalt.err (!%p426_p4)
}
  0x2c   :  { %s430_s3 = scalar_lea.vmem %s23_s28, 128  ;;  %p435_p6 = scmp.lt.s32.totalorder %s23_s28, %s23_s28 }
  0x2d   :  { %p431_p5 = scmp.ne.s32.totalorder %s23_s28, %s430_s3  ;;  %p436_p7 = scmp.lt.s32.totalorder %s430_s3, %s430_s3 }
  0x2f   :  { %p437_p8 = por %p436_p7, %p435_p6 }
  0x31   :  { %p438_p9 = pnand %p437_p8, %p431_p5 }
  0x33   :  { %441 = shalt.err (!%p438_p9)
}
  0x34   :  { %25 = dma.hbm_to_vmem [thread:$0]  %s664_s0, 128, %s23_s28, [#allocation3]  }
  0x35   :  { %s442_s18 = scalar_lea.hbm %s666_s2, 128 }
  0x36   :  { %p443_p10 = scmp.ne.s32.totalorder %s666_s2, %s442_s18  ;;  %p446_p11 = scmp.lt.u32.totalorder %s442_s18, %s666_s2 }
  0x38   :  { %p448_p12 = pnand %p446_p11, %p443_p10 }
  0x3a   :  { %451 = shalt.err (!%p448_p12)
}
  0x3b   :  { %s452_s24 = scalar_lea.vmem %s43_s30, 128  ;;  %p457_p0 = scmp.lt.s32.totalorder %s43_s30, %s43_s30 }
  0x3c   :  { %p453_p13 = scmp.ne.s32.totalorder %s43_s30, %s452_s24  ;;  %p458_p1 = scmp.lt.s32.totalorder %s452_s24, %s452_s24 }
  0x3e   :  { %p459_p2 = por %p458_p1, %p457_p0 }
  0x40   :  { %p460_p3 = pnand %p459_p2, %p453_p13 }
  0x42   :  { %463 = shalt.err (!%p460_p3)
}
  0x43   :  { %45 = dma.hbm_to_vmem [thread:$0]  %s666_s2, 128, %s43_s30, [#allocation6]  }
  0x44   :  { %s522_s26 = smov [#allocation10]   ;;  %s464_s9 = scalar_lea.hbm %s669_s5, 512 }
  0x45   :  { %s65_s28 = sshll.u32 %s522_s26, 4  ;;  %p465_p4 = scmp.ne.s32.totalorder %s669_s5, %s464_s9  ;;  %s66_s28 = int_to_ptr.vmem [resolvable:$true] %s65_s28 }
  0x46   :  { %p468_p5 = scmp.lt.u32.totalorder %s464_s9, %s669_s5 }
  0x48   :  { %p470_p6 = pnand %p468_p5, %p465_p4 }
  0x4a   :  { %473 = shalt.err (!%p470_p6)
}
  0x4b   :  { %s474_s14 = scalar_lea.vmem %s66_s28, 512  ;;  %p479_p8 = scmp.lt.s32.totalorder %s66_s28, %s66_s28 }
  0x4c   :  { %p475_p7 = scmp.ne.s32.totalorder %s66_s28, %s474_s14  ;;  %p480_p9 = scmp.lt.s32.totalorder %s474_s14, %s474_s14 }
  0x4e   :  { %p481_p10 = por %p480_p9, %p479_p8 }
  0x50   :  { %p482_p11 = pnand %p481_p10, %p475_p7 }
  0x52   :  { %485 = shalt.err (!%p482_p11)
}
  0x53   :  { %71 = dma.hbm_to_vmem [thread:$0]  %s669_s5, 512, %s66_s28, [#allocation9], %s518_s1, %s518_s1, %s519_s23  }
  0x54   :  { %508 = dma.done.wait [#allocation3], 128  }
  0x55   :  { %509 = vsyncadd [#allocation3], 4294967168 }
  0x56   :  { %510 = dma.done.wait [#allocation6], 256  }
  0x57   :  { %511 = vsyncadd [#allocation6], 4294967040 }
  0x58   :  { %512 = dma.done.wait [#allocation9], 1024  }
  0x59   :  { %513 = vsyncadd [#allocation9], 4294966272  ;;  %vm93_vm0 = vcmask 0   ;;  %v523_v0 = vmov 0.0|0.0   ;;  %v524_v1 = vmov 0.0   ;;  %vm525_vm1 = vmmov 0  }
  0x5a   :  { %348 = vmatprep.subr.bf16.mxu0 %v523_v0  ;;  %94 = vst.msk [vmem:[#allocation11] sm:$0x1] %vm93_vm0, %v524_v1  ;;  %334 = vmatprep.mubr.msk.f32.mxu0 %vm525_vm1, %v524_v1  ;;  %v96_v2 = vld [vmem:[#allocation8] sm:$0xff]  ;;  %v97_v3 = vld [vmem:[#allocation8 + $0x8] sm:$0xff]  ;;  %v98_v4 = vld [vmem:[#allocation8 + $0x10] sm:$0xff]  ;;  %vm107_vm2 = vcmask 261120  }
  0x5b   :  { %354 = vmatprep.subr.bf16.mxu1 %v523_v0  ;;  %345 = vmatprep.mubr.msk.f32.mxu1 %vm525_vm1, %v524_v1  ;;  %v349_v5 = vpack.c.bf16 %v97_v3, %v96_v2  ;;  %v99_v6 = vld [vmem:[#allocation8 + $0x18] sm:$0xff]  ;;  %v182_v7 = vld [vmem:[#allocation10] sm:$0xff]  ;;  %v183_v8 = vld [vmem:[#allocation10 + $0x8] sm:$0xff] }
  0x5c   :  { %v352_v9 = vpack.c.bf16 %v99_v6, %v98_v4  ;;  %v355_v10 = vpack.c.bf16 %v183_v8, %v182_v7  ;;  %v95_v11 = vld [vmem:[#allocation2] sm:$0xff]  ;;  %v184_v12 = vld [vmem:[#allocation10 + $0x10] sm:$0xff]  ;;  %v185_v13 = vld [vmem:[#allocation10 + $0x18] sm:$0xff] }
  0x5d   :  { %350 = vmatpush3.bf16.msra.mxu0 %v349_v5  ;;  %v358_v14 = vpack.c.bf16 %v185_v13, %v184_v12  ;;  %v312_v15 = vld [vmem:[%s668_s4] ss:$0 sm:$0xff]  ;;  %s526_s4 = smov 96   ;;  %v270_v28 = vld [vmem:[#allocation5] sm:$0xff]  ;;  %v271_v29 = vld [vmem:[#allocation7] sm:$0xff] }
  0x5e   :  { %351 = vmatprep.subr.bf16.mxu0 %v523_v0  ;;  %356 = vmatpush3.bf16.msra.mxu1 %v355_v10  ;;  %v314_v20 = vld [vmem:[%s670_s6] ss:$0 sm:$0xff]  ;;  %s527_s6 = smov [#allocation11]  }
  0x5f   :  { %357 = vmatprep.subr.bf16.mxu1 %v523_v0  ;;  %s301_s27 = sshll.u32 %s527_s6, 4  ;;  %s302_s27 = int_to_ptr.vmem [resolvable:$true] %s301_s27 }
  0x60   :  { %s486_s15 = scalar_lea.vmem %s302_s27, 16  ;;  %s490_s16 = scalar_lea.vmem %s302_s27, 32 }
  0x61   :  { %353 = vmatpush3.bf16.msra.mxu0 %v352_v9  ;;  %v291_v44 = vld [vmem:[#allocation11] sm:$0x1]  ;;  %p487_p12 = scmp.ne.s32.totalorder %s302_s27, %s486_s15  ;;  %p491_p13 = scmp.lt.s32.totalorder %s302_s27, %s302_s27 }
  0x62   :  { %359 = vmatpush3.bf16.msra.mxu1 %v358_v14  ;;  %p492_p0 = scmp.lt.s32.totalorder %s490_s16, %s486_s15 }
  0x64   :  { %335 = vmatmul.mubr.msk.f32.vlgmr.msra.gmra.mrb[0].mxu0 %vm107_vm2, %v95_v11  ;;  %p493_p1 = por %p492_p0, %p491_p13 }
  0x66   :  { %p494_p2 = pnand %p493_p1, %p487_p12 }
 0x137   :  { %v177_v16 = vpop.f32.mrb[0].mxu0 }
 0x138   :  { %v178_v17 = vadd.f32 %v312_v15, %v177_v16  ;;  %v336_v18 = vpop.f32.mrb[1].mxu0 }
 0x13a   :  { %v181_v19 = vmax.f32 %v178_v17, 0.0 }
 0x13c   :  { %346 = vmatmul.mubr.msk.f32.vlgmr.msra.gmra.mrb[0].mxu1 %vm107_vm2, %v181_v19 }
 0x20f   :  { %v262_v21 = vpop.f32.mrb[0].mxu1 }
 0x210   :  { %v263_v22 = vadd.f32 %v314_v20, %v262_v21  ;;  %v347_v23 = vpop.f32.mrb[1].mxu1 }
 0x212   :  { %372 = vtanh.f32 %v263_v22  ;;  %v272_v30 = vsub.f32 %v263_v22, %v271_v29  ;;  %v274_v31 = vsub.f32 %v263_v22, %v270_v28 }
 0x214   :  { %v273_v32 = vmul.f32 %v272_v30, %v272_v30  ;;  %v275_v33 = vmul.f32 %v274_v31, %v274_v31 }
 0x216   :  { %v276_v34 = vsub.f32 %v273_v32, %v275_v33 }
 0x21c   :  { %v373_v24 = vpop.eup %372 }
 0x21d   :  { %v267_v25 = vsub.f32 0.0, %v373_v24 }
 0x21f   :  { %v268_v26 = vmul.f32 1.442695, %v267_v25 }
 0x221   :  { %374 = vpow2.f32 %v268_v26 }
 0x22b   :  { %v375_v27 = vpop.eup %374 }
 0x22c   :  { %278 = vrot.lane.b32.xlu0 %v375_v27, %s526_s4 }
 0x29e   :  { %v279_v35 = vpop.permute.xlu0 %278 }
 0x29f   :  { %v281_v36 = vmul.f32 %v279_v35, %v276_v34 }
 0x2a1   :  { %v282_v37 = vsel %vm107_vm2, %v281_v36, 0.0 }
 0x2a2   :  { %283 = vadd.xlane.f32.xlu0 %v282_v37 }
 0x32f   :  { %v284_v38 = vpop.xlane.xlu0 %283 }
 0x330   :  { %v285_v39 = vrot.slane %v284_v38, 4 }
 0x332   :  { %v286_v40 = vadd.f32 %v285_v39, %v284_v38 }
 0x334   :  { %v287_v41 = vrot.slane %v286_v40, 2 }
 0x336   :  { %v288_v42 = vadd.f32 %v287_v41, %v286_v40 }
 0x338   :  { %v289_v43 = vrot.slane %v288_v42, 1 }
 0x33a   :  { %v290_v45 = vadd.f32 %v289_v43, %v288_v42 }
 0x33c   :  { %v292_v46 = vadd.f32 %v291_v44, %v290_v45 }
 0x33e   :  { %294 = vst.msk [vmem:[#allocation11] sm:$0x1] %vm93_vm0, %v292_v46 }
 0x33f   :  { %497 = shalt.err (!%p494_p2)
}
 0x340   :  { %s498_s19 = scalar_lea.hbm %s671_s7, 16 }
 0x341   :  { %p499_p3 = scmp.ne.s32.totalorder %s671_s7, %s498_s19  ;;  %p502_p4 = scmp.lt.u32.totalorder %s498_s19, %s671_s7 }
 0x343   :  { %p504_p5 = pnand %p502_p4, %p499_p3 }
 0x345   :  { %507 = shalt.err (!%p504_p5)
}
 0x346   :  { %304 = dma.vmem_to_hbm [thread:$0]  %s302_s27, 16, %s671_s7, [#allocation4]  }
 0x347   :  { %514 = dma.done.wait [#allocation4], 16  }
 0x348   :  { %515 = vsyncadd [#allocation4], 4294967280 }
 0x349   :  { %308 = vsyncpa [#allocation3], 1 }
 0x34a   :  { %309 = vsyncpa [#allocation6], 1 }
 0x34b   :  { %310 = vsyncpa [#allocation9], 1 }
 0x34c   :  { %311 = vsyncpa [#allocation4], 1 }

</bundles_post_ra>
